<compile_context>
chip_gen: v6e
topology: v6e:2x2x1
jax: 0.10.0
libtpu: 0.0.40
codegen_flags: <defaults>
</compile_context>

<pallas_src>
import jax
import jax.numpy as jnp
from jax.experimental import pallas as pl
from jax.experimental.pallas import tpu as pltpu

_LOG_2PI = 1.8378770664093453  # log(2*pi)

_LANES = 512                     # lane-dense last dim (multiple of 128)
_MAX_BLOCK_ROWS = 1024           # 1024 x 512 f32 = 2 MiB per input block
_MIN_BLOCK_ROWS = 64             # keep ~0.35us per-step overhead well hidden
_TARGET_BLOCKS = 4               # >= 4 blocks -> both v7x TCs + pipelining
_VMEM_LIMIT_BYTES = 32 * 1024 * 1024  # <= physical VMEM on v5e/v6e/v7x


def _choose_block_rows(rows, max_block_rows=_MAX_BLOCK_ROWS):
    """Block row count: multiple of 8, <= max, >= 64 rows, >= ~4 blocks when possible."""
    if rows <= _MIN_BLOCK_ROWS:
        return rows                               # single full-extent block (tiny input)
    br = min(max_block_rows, max(_MIN_BLOCK_ROWS, pl.cdiv(rows, _TARGET_BLOCKS)))
    br = min(br, rows)
    return max((br // 8) * 8, 8)


def _make_sum_kernel(block_rows, total_rows):
    """Per-block partial sums of the Gaussian log-pdf (sum-only path, no elementwise write)."""
    needs_mask = (total_rows % block_rows) != 0   # last grid block is partial
    reduce_to_8 = (block_rows % 8) == 0

    def kernel(params_ref, y_ref, psum_ref):
        mu = params_ref[0]
        neg_half_inv_var = params_ref[1]          # -0.5 / sigma^2
        c0 = params_ref[2]                        # -(log sigma + 0.5 * log 2pi)
        d = y_ref[...] - mu
        lp = c0 + neg_half_inv_var * (d * d)
        if needs_mask:
            # Zero out the rows of the (partial) last block that lie past the array.
            row0 = pl.program_id(0) * block_rows
            ridx = row0 + jax.lax.broadcasted_iota(jnp.int32, (block_rows, _LANES), 0)
            lp = jnp.where(ridx < total_rows, lp, 0.0)
        if reduce_to_8:
            # Stop the in-kernel reduce at 8 sublanes: aligned (8, 512) output tile,
            # plain vreg adds (no XLU fold); the final fold is a tiny host-side sum.
            acc = lp[0:8]
            for g in range(1, block_rows // 8):
                acc = acc + lp[g * 8:(g + 1) * 8]
            psum_ref[...] = acc
        else:
            psum_ref[...] = lp                    # tiny single-block input (<8 rows etc.)

    return kernel


def _elementwise_kernel(params_ref, y_ref, lp_ref):
    """Elementwise log-pdf (verification / per-sample path)."""
    mu = params_ref[0]
    neg_half_inv_var = params_ref[1]
    c0 = params_ref[2]
    d = y_ref[...] - mu
    lp_ref[...] = (c0 + neg_half_inv_var * (d * d)).astype(lp_ref.dtype)


def _scalar_params(mu, sigma):
    """Hoisted scalar constants (exact scalar divide/log, computed once host-side)."""
    mu_s = jnp.asarray(mu, jnp.float32).reshape(())
    sigma_s = jnp.asarray(sigma, jnp.float32).reshape(())
    neg_half_inv_var = -0.5 / (sigma_s * sigma_s)
    c0 = -(jnp.log(sigma_s) + 0.5 * jnp.float32(_LOG_2PI))
    return mu_s, neg_half_inv_var, c0, jnp.stack([mu_s, neg_half_inv_var, c0])


def _split_main_tail(y_flat):
    """Lane-aligned main prefix ((rows, 512), free reshape when N%512==0) + short tail."""
    y_flat = jnp.asarray(y_flat, jnp.float32).reshape(-1)
    n = y_flat.shape[0]
    n_main = (n // _LANES) * _LANES
    y_main = y_flat[:n_main].reshape(n_main // _LANES, _LANES) if n_main else None
    tail = y_flat[n_main:] if n_main < n else None
    return y_main, tail


def gaussian_log_prob_sum(y_flat, mu, sigma):
    """sum_i Normal(mu, sigma).log_prob(y_i).  Y crosses HBM exactly once."""
    mu_s, neg_half_inv_var, c0, params = _scalar_params(mu, sigma)
    y_main, tail = _split_main_tail(y_flat)
    total = jnp.float32(0.0)

    if y_main is not None:
        rows = y_main.shape[0]
        block_rows = _choose_block_rows(rows)
        num_blocks = pl.cdiv(rows, block_rows)
        out_rows = 8 if (block_rows % 8) == 0 else block_rows

        partials = pl.pallas_call(
            _make_sum_kernel(block_rows, rows),
            out_shape=jax.ShapeDtypeStruct((num_blocks * out_rows, _LANES), jnp.float32),
            grid_spec=pltpu.PrefetchScalarGridSpec(
                num_scalar_prefetch=1,
                grid=(num_blocks,),
                in_specs=[pl.BlockSpec((block_rows, _LANES), lambda i, p: (i, 0))],
                out_specs=pl.BlockSpec((out_rows, _LANES), lambda i, p: (i, 0)),
            ),
            compiler_params=pltpu.CompilerParams(
                dimension_semantics=("parallel",),   # independent blocks -> both v7x TCs
                vmem_limit_bytes=_VMEM_LIMIT_BYTES,
            ),
        )(params, y_main)
        total = total + jnp.sum(partials)

    if tail is not None:                             # <512 leftover samples: plain JAX
        d = tail - mu_s
        total = total + jnp.sum(c0 + neg_half_inv_var * (d * d))
    return total


def gaussian_log_prob_elementwise(y_flat, mu, sigma):
    """Normal(mu, sigma).log_prob(Y) per element (verification / per-sample path)."""
    mu_s, neg_half_inv_var, c0, params = _scalar_params(mu, sigma)
    y_main, tail = _split_main_tail(y_flat)
    pieces = []

    if y_main is not None:
        rows = y_main.shape[0]
        block_rows = _choose_block_rows(rows)
        num_blocks = pl.cdiv(rows, block_rows)

        lp2d = pl.pallas_call(
            _elementwise_kernel,
            out_shape=jax.ShapeDtypeStruct((rows, _LANES), jnp.float32),
            grid_spec=pltpu.PrefetchScalarGridSpec(
                num_scalar_prefetch=1,
                grid=(num_blocks,),
                in_specs=[pl.BlockSpec((block_rows, _LANES), lambda i, p: (i, 0))],
                out_specs=pl.BlockSpec((block_rows, _LANES), lambda i, p: (i, 0)),
            ),
            compiler_params=pltpu.CompilerParams(
                dimension_semantics=("parallel",),
                vmem_limit_bytes=_VMEM_LIMIT_BYTES,
            ),
        )(params, y_main)
        pieces.append(lp2d.reshape(-1))              # free bitcast back to 1D

    if tail is not None:
        d = tail - mu_s
        pieces.append(c0 + neg_half_inv_var * (d * d))

    return pieces[0] if len(pieces) == 1 else jnp.concatenate(pieces)


class LearningGaussianDistPallas:
    """JAX/Pallas port of the torch module ('ml' and 'map' inference paths)."""

    def __init__(self, inference="ml"):
        self.inference = inference
        # Matches torch.nn.Parameter(torch.tensor([0.0])) / torch.tensor([1.0]).
        self.mu = jnp.array([0.0], dtype=jnp.float32)
        self.sigma = jnp.array([1.0], dtype=jnp.float32)
        if inference == "vi":
            self.q_mu = jnp.array([0.0, 0.0], dtype=jnp.float32)
            self.q_log_sigma = jnp.array([0.0, 0.0], dtype=jnp.float32)
        # TODO(synk): 'vi' branch (q.rsample ELBO + kl_divergence against the Normal
        # prior) is host-side distribution bookkeeping, not kernel work; not ported.

    def forward(self, mu=None, sigma=None):
        # Stand-in for D.Normal(mu, sigma): returns the distribution parameters.
        if self.inference == "vi":
            return (mu, sigma)
        return (self.mu, self.sigma)

    def log_prob(self, Y, mu=None, sigma=None):
        m, s = self.forward(mu, sigma)
        return gaussian_log_prob_sum(Y, m, s)

    def log_prob_elementwise(self, Y, mu=None, sigma=None):
        m, s = self.forward(mu, sigma)
        return gaussian_log_prob_elementwise(Y, m, s)

    def log_prior(self):
        # 'map' path: Normal(0,1).log_prob(mu) + Gamma(1,1).log_prob(sigma).
        # Scalar bookkeeping -> plain JAX (not kernel material).
        mu = self.mu[0]
        sigma = self.sigma[0]
        normal_lp = -0.5 * mu * mu - 0.5 * jnp.float32(_LOG_2PI)
        gamma_lp = -sigma  # Gamma(1,1) == Exp(1): log pdf(x) = -x
        return normal_lp + gamma_lp

    def loss_fn(self, Y):
        if self.inference == "map":
            return -(self.log_prob(Y) + self.log_prior())
        return -self.log_prob(Y)


if __name__ == "__main__":
    def ref_logpdf(y, mu, sigma):
        return -0.5 * ((y - mu) / sigma) ** 2 - jnp.log(sigma) - 0.5 * jnp.log(2.0 * jnp.pi)

    key = jax.random.PRNGKey(0)

    # 1) Lane-aligned small input (N % 512 == 0 -> zero-copy main path, single block).
    Y = jax.random.normal(key, (2048,), dtype=jnp.float32) * 1.7 + 0.5
    model = LearningGaussianDistPallas(inference="ml")
    lp_elem = model.log_prob_elementwise(Y)
    lp_sum = model.log_prob(Y)
    loss = model.loss_fn(Y)
    jax.block_until_ready((lp_elem, lp_sum, loss))

    mu0, s0 = model.mu[0], model.sigma[0]
    ref_elem = ref_logpdf(Y, mu0, s0)
    ref_sum = jnp.sum(ref_elem)
    assert jnp.allclose(lp_elem, ref_elem, atol=1e-5, rtol=1e-5), "elementwise mismatch"
    assert jnp.allclose(lp_sum, ref_sum, atol=5e-2, rtol=1e-5), "sum mismatch"
    assert jnp.allclose(loss, -ref_sum, atol=5e-2, rtol=1e-5), "loss mismatch"

    # 2) Ragged input + non-default params ('map' path; <512-element tail in plain JAX).
    Y2 = jax.random.normal(jax.random.PRNGKey(1), (1000,), dtype=jnp.float32) * 0.8 - 0.3
    model2 = LearningGaussianDistPallas(inference="map")
    model2.mu = jnp.array([0.5], dtype=jnp.float32)
    model2.sigma = jnp.array([1.7], dtype=jnp.float32)
    lp2_elem = model2.log_prob_elementwise(Y2)
    lp2_sum = model2.log_prob(Y2)
    loss2 = model2.loss_fn(Y2)
    jax.block_until_ready((lp2_elem, lp2_sum, loss2))

    ref2_elem = ref_logpdf(Y2, model2.mu[0], model2.sigma[0])
    assert jnp.allclose(lp2_elem, ref2_elem, atol=1e-5, rtol=1e-5), "ragged elementwise mismatch"
    assert jnp.allclose(lp2_sum, jnp.sum(ref2_elem), atol=5e-2, rtol=1e-5), "ragged sum mismatch"
    exp_loss2 = -(jnp.sum(ref2_elem) + model2.log_prior())
    assert jnp.allclose(loss2, exp_loss2, atol=5e-2, rtol=1e-5), "ragged loss mismatch"

    # 3) Multi-block grid with a partial last block (exercises the in-kernel row mask)
    #    plus a short tail.
    Y3 = jax.random.normal(jax.random.PRNGKey(2), (70_000,), dtype=jnp.float32) * 1.2 + 0.1
    model3 = LearningGaussianDistPallas(inference="ml")
    lp3_sum = model3.log_prob(Y3)
    lp3_elem = model3.log_prob_elementwise(Y3)
    jax.block_until_ready((lp3_sum, lp3_elem))

    ref3_elem = ref_logpdf(Y3, model3.mu[0], model3.sigma[0])
    assert jnp.allclose(lp3_elem, ref3_elem, atol=1e-5, rtol=1e-5), "multi-block elementwise mismatch"
    assert jnp.allclose(lp3_sum, jnp.sum(ref3_elem), atol=1.0, rtol=1e-4), "multi-block sum mismatch"

    print("KERNEL_OK")
</pallas_src>

<mosaic_0001>
module attributes {stable_mosaic.version = 11 : i64} {
  func.func @_elementwise_kernel(%arg0: i32, %arg1: memref<3xf32, #tpu.memory_space<smem>>, %arg2: memref<4x512xf32, #tpu.memory_space<vmem>>, %arg3: memref<4x512xf32, #tpu.memory_space<vmem>>) attributes {dimension_semantics = [#tpu.dimension_semantics<parallel>], iteration_bounds = array<i64: 1>, scalar_prefetch = 1 : i64, scratch_operands = 0 : i64, tpu.core_type = #tpu.core_type<tc>, window_params = [{transform_indices = @transform_0, window_bounds = array<i64: 4, 512>}, {transform_indices = @transform_1, window_bounds = array<i64: 4, 512>}]} {
    %c0 = arith.constant 0 : index
    %0 = memref.load %arg1[%c0] : memref<3xf32, #tpu.memory_space<smem>>
    %c1 = arith.constant 1 : index
    %1 = memref.load %arg1[%c1] : memref<3xf32, #tpu.memory_space<smem>>
    %c2 = arith.constant 2 : index
    %2 = memref.load %arg1[%c2] : memref<3xf32, #tpu.memory_space<smem>>
    %c0_0 = arith.constant 0 : index
    %c0_1 = arith.constant 0 : index
    %3 = vector.load %arg2[%c0_0, %c0_1] : memref<4x512xf32, #tpu.memory_space<vmem>>, vector<4x512xf32>
    %4 = vector.broadcast %0 : f32 to vector<4x512xf32>
    %5 = arith.subf %3, %4 : vector<4x512xf32>
    %6 = arith.mulf %5, %5 : vector<4x512xf32>
    %7 = vector.broadcast %1 : f32 to vector<4x512xf32>
    %8 = arith.mulf %7, %6 : vector<4x512xf32>
    %9 = vector.broadcast %2 : f32 to vector<4x512xf32>
    %10 = arith.addf %9, %8 : vector<4x512xf32>
    %c0_2 = arith.constant 0 : index
    %c0_3 = arith.constant 0 : index
    %11 = vector.load %arg3[%c0_2, %c0_3] : memref<4x512xf32, #tpu.memory_space<vmem>>, vector<4x512xf32>
    tpu.vector_store %arg3[%c0_2, %c0_3], %10 {strides = array<i32>} : memref<4x512xf32, #tpu.memory_space<vmem>>, vector<4x512xf32>,
    return
  }
  func.func @transform_0(%arg0: i32, %arg1: memref<3xf32, #tpu.memory_space<smem>>) -> (i32, i32) {
    %c0_i32 = arith.constant 0 : i32
    %c0_i32_0 = arith.constant 0 : i32
    return %arg0, %c0_i32 : i32, i32
  }
  func.func @transform_1(%arg0: i32, %arg1: memref<3xf32, #tpu.memory_space<smem>>) -> (i32, i32) {
    %c0_i32 = arith.constant 0 : i32
    %c0_i32_0 = arith.constant 0 : i32
    return %arg0, %c0_i32 : i32, i32
  }
}

</mosaic_0001>

<bundles_post_ra>
// kernel: tpu_custom_call.1
= control target key start
LH: loop header
LB: loop body
LE: loop exit
PB: predicated region body
PF: predicated region fallthrough
CT: control target
= control target key end

     0   :  { %s118_s9 = smov [#allocation3]   ;;  %s145_s0 = inlined_call_operand.hbm [shape: f32[3], index: 0, kind: input, shape index: {}]   ;;  %s146_s1 = inlined_call_operand.hbm [shape: f32[4,512], index: 1, kind: input, shape index: {}]   ;;  %s147_s2 = inlined_call_operand.hbm [shape: f32[4,512], index: 2, kind: output, shape index: {}]  }
   0x1   :  { %8 = dma.hbm_to_smem %s145_s0, 16, %s118_s9, [#allocation2] }
   0x2   :  { %112 = dma.done.wait [#allocation2], 16 }
   0x3   :  { %113 = vsyncadd [#allocation2], 4294967280 }
   0x4   :  { %10 = sfence }
   0x5   :  { %11 = vsyncpa [#allocation5], 0 }
   0x6   :  { %12 = vsyncpa [#allocation6], 0  ;;  %s119_s12 = smov [#allocation4]  }
   0x7   :  { %s19_s13 = sshll.u32 %s119_s12, 4  ;;  %s20_s13 = int_to_ptr.vmem [resolvable:$true] %s19_s13 }
   0x8   :  { %s80_s14 = scalar_lea.vmem %s20_s13, 256  ;;  %p85_p1 = scmp.lt.s32.totalorder %s20_s13, %s20_s13 }
   0x9   :  { %p81_p0 = scmp.ne.s32.totalorder %s20_s13, %s80_s14  ;;  %p86_p2 = scmp.lt.s32.totalorder %s80_s14, %s80_s14 }
   0xb   :  { %p87_p3 = por %p86_p2, %p85_p1 }
   0xd   :  { %p88_p4 = pnand %p87_p3, %p81_p0 }
   0xf   :  { %91 = shalt.err (!%p88_p4)
}
  0x10   :  { %22 = dma.hbm_to_vmem [thread:$0]  %s146_s1, 256, %s20_s13, [#allocation5]  }
  0x11   :  { %114 = dma.done.wait [#allocation5], 256  }
  0x12   :  { %115 = vsyncadd [#allocation5], 4294967040  ;;  %s26_s0 = sld [smem:[#allocation3]]  ;;  %v29_v0 = vld [vmem:[#allocation4] sm:$0xff]  ;;  %v30_v2 = vld [vmem:[#allocation4 + $0x8] sm:$0xff]  ;;  %s120_s19 = smov [#allocation7]  }
  0x13   :  { %s59_s17 = sld [smem:[#allocation3 + $0x1]]  ;;  %s50_s20 = sshll.u32 %s120_s19, 4  ;;  %s51_s20 = int_to_ptr.vmem [resolvable:$true] %s50_s20 }
  0x14   :  { %s60_s18 = sld [smem:[#allocation3 + $0x2]]  ;;  %s92_s1 = scalar_lea.vmem %s51_s20, 256 }
  0x15   :  { %p93_p5 = scmp.ne.s32.totalorder %s51_s20, %s92_s1  ;;  %p97_p6 = scmp.lt.s32.totalorder %s51_s20, %s51_s20 }
  0x16   :  { %p98_p7 = scmp.lt.s32.totalorder %s92_s1, %s92_s1 }
  0x18   :  { %v31_v1 = vstv %s26_s0  ;;  %p99_p8 = por %p98_p7, %p97_p6 }
  0x19   :  { %v32_v3 = vsub.f32 %v29_v0, %v31_v1  ;;  %v33_v4 = vsub.f32 %v30_v2, %v31_v1  ;;  %v36_v5 = vstv %s59_s17 }
  0x1a   :  { %v39_v8 = vstv %s60_s18  ;;  %p100_p9 = pnand %p99_p8, %p93_p5 }
  0x1b   :  { %v34_v6 = vmul.f32 %v32_v3, %v32_v3  ;;  %v35_v7 = vmul.f32 %v33_v4, %v33_v4 }
  0x1d   :  { %v37_v9 = vmul.f32 %v36_v5, %v34_v6  ;;  %v38_v10 = vmul.f32 %v36_v5, %v35_v7 }
  0x1f   :  { %v40_v11 = vadd.f32 %v39_v8, %v37_v9  ;;  %v41_v12 = vadd.f32 %v39_v8, %v38_v10 }
  0x21   :  { %42 = vst [vmem:[#allocation7] sm:$0xff] %v40_v11  ;;  %43 = vst [vmem:[#allocation7 + $0x8] sm:$0xff] %v41_v12 }
  0x22   :  { %103 = shalt.err (!%p100_p9)
}
  0x23   :  { %53 = dma.vmem_to_hbm [thread:$0]  %s51_s20, 256, %s147_s2, [#allocation6]  }
  0x24   :  { %116 = dma.done.wait [#allocation6], 256  }
  0x25   :  { %117 = vsyncadd [#allocation6], 4294967040 }
  0x26   :  { %57 = vsyncpa [#allocation5], 1 }
  0x27   :  { %58 = vsyncpa [#allocation6], 1 }

</bundles_post_ra>
